<compile_context>
chip_gen: v7x
topology: tpu7x:2x2x1
jax: 0.10.0
libtpu: 0.0.40
codegen_flags: <defaults>
</compile_context>

<pallas_src>
import jax
import jax.numpy as jnp
from jax.experimental import pallas as pl
from jax.experimental.pallas import tpu as pltpu


def _round_up(x, m):
    return (x + m - 1) // m * m


def patch_embed_kernel(x_ref, w_ref, b_ref, o_ref):
    # (TM, K_pad) @ (K_pad, TN) on the MXU with f32 accumulation, then bias add.
    acc = jnp.dot(x_ref[...], w_ref[...], preferred_element_type=jnp.float32)
    o_ref[...] = (acc + b_ref[...]).astype(o_ref.dtype)


def patch_embed_2d(x, weight, bias, patch_size, *, compute_dtype=None,
                   out_dtype=None):
    """x: (B, C, H, W) NCHW; weight: (E, C, p, p); bias: (E,) -> (B, N, E)."""
    B, C, H, W = x.shape
    E = weight.shape[0]
    p = patch_size
    assert H % p == 0 and W % p == 0, "spatial dims must be divisible by patch"
    Hp, Wp = H // p, W // p
    M = B * Hp * Wp
    K = C * p * p

    if compute_dtype is None:
        # bf16 streams + bf16 MXU (accumulation stays f32) is the fast path on
        # every TPU generation; pass jnp.float32 explicitly for exact results.
        compute_dtype = jnp.bfloat16
    if out_dtype is None:
        out_dtype = x.dtype
    itemsize = jnp.dtype(compute_dtype).itemsize
    out_itemsize = jnp.dtype(out_dtype).itemsize

    # ---- patch extraction (pure layout work, one XLA transpose) ------------
    # allow_input_fusion below lets XLA fold this producer into the kernel's
    # input fetch when it can.
    # TODO(synk): a fully fused version would grid over (B,) with an NCHW
    # x BlockSpec and do the (c,ky,kx) flatten in VMEM; that lane->sublane
    # relayout is not reliably lowerable yet, so the im2col stays in XLA.
    patches = (
        x.reshape(B, C, Hp, p, Wp, p)
        .transpose(0, 2, 4, 1, 3, 5)          # (B, Hp, Wp, C, p, p)
        .reshape(M, K)
        .astype(compute_dtype)
    )
    w_flat = weight.reshape(E, K).T.astype(compute_dtype)   # (K, E)
    b2 = bias.reshape(1, E).astype(jnp.float32)

    # ---- zero-pad K (lane dim of patch tile / MXU depth) and E to 128 ------
    K_pad = _round_up(K, 128)
    if K_pad != K:
        patches = jnp.pad(patches, ((0, 0), (0, K_pad - K)))
        w_flat = jnp.pad(w_flat, ((0, K_pad - K), (0, 0)))
    E_pad = _round_up(E, 128)
    if E_pad != E:
        w_flat = jnp.pad(w_flat, ((0, 0), (0, E_pad - E)))
        b2 = jnp.pad(b2, ((0, 0), (0, E_pad - E)))

    # ---- VMEM budget per generation -----------------------------------------
    try:
        vmem_phys = int(getattr(pltpu.get_tpu_info(), "vmem_capacity_bytes", 0)
                        or (64 << 20))
    except Exception:
        vmem_phys = 64 << 20                      # conservative (v7x per-TC)
    budget = min(28 << 20, vmem_phys // 3)        # headroom for Mosaic internals

    # ---- E tile: full E_pad when the weight fits VMEM-resident --------------
    # Budget the weight at 2 buffers even though we request Buffered(1) below,
    # so the double-buffered fallback path also fits.
    tn = 128
    for cand in (E_pad, 1024, 512, 256, 128):
        if cand <= E_pad and E_pad % cand == 0 and \
           2 * K_pad * cand * itemsize + 2 * cand * 4 <= budget // 2:
            tn = cand
            break

    # ---- M tile: as large as the remaining budget allows (up to 2048 rows) --
    sub = 16 if itemsize == 2 else 8              # sublane multiple per dtype
    rem = budget - (2 * K_pad * tn * itemsize + 2 * tn * 4)
    per_row = 2 * K_pad * itemsize + 2 * tn * out_itemsize   # dbl-buffered in/out
    tm = sub
    for cand in (2048, 1024, 512, 256, 128, 64, 32, 16, 8):
        if cand >= sub and cand * per_row <= rem:
            tm = cand
            break
    tm = min(tm, _round_up(M, sub))
    # >= 2 M tiles whenever possible: keeps both v7x TensorCores busy and gives
    # the DMA pipeline something to overlap on every generation.
    if M > sub:
        tm = min(tm, _round_up(-(-M // 2), sub))
    tm = max(tm, sub)

    # ---- row-pad M to a multiple of tm (zero rows give bias-only outputs,
    # sliced off afterwards) ---------------------------------------------------
    M_pad = _round_up(M, tm)
    if M_pad != M:
        patches = jnp.pad(patches, ((0, M_pad - M), (0, 0)))

    grid = (E_pad // tn, M_pad // tm)    # E outer: weight fetched once per E tile

    cost = pl.CostEstimate(
        flops=2 * M * K * E,
        transcendentals=0,
        bytes_accessed=int(M * K * itemsize + K * E * itemsize + E * 4
                           + M * E * out_itemsize),
    )

    need = (2 * tm * K_pad * itemsize + 2 * tm * tn * out_itemsize
            + 2 * K_pad * tn * itemsize + 2 * tn * 4)
    vmem_limit = int(min(64 << 20, max(32 << 20, need + need // 4 + (2 << 20))))

    compiler_params = pltpu.CompilerParams(
        # Both grid axes index independent output tiles (K reduction is inside
        # the dot) -> megacore sharding on v7x, harmless on v5e/v6e.
        dimension_semantics=("parallel", "parallel"),
        vmem_limit_bytes=vmem_limit,
        # Let XLA fold the patch-extraction producer into the input fetch so
        # the (M, K) patch matrix need not round-trip HBM.
        allow_input_fusion=[True, False, False],
    )

    def _bspec(shape, imap, mode=None):
        if mode is None:
            return pl.BlockSpec(shape, imap)
        return pl.BlockSpec(shape, imap, pipeline_mode=mode)

    def _run(single_buffer_resident):
        mode = None
        if single_buffer_resident and hasattr(pl, "Buffered"):
            mode = pl.Buffered(1)        # weight/bias never change: one buffer
        grid_spec = pl.GridSpec(
            grid=grid,
            in_specs=[
                _bspec((tm, K_pad), lambda j, i: (i, 0)),          # streams
                _bspec((K_pad, tn), lambda j, i: (0, j), mode),    # resident
                _bspec((1, tn), lambda j, i: (0, j), mode),        # resident
            ],
            out_specs=pl.BlockSpec((tm, tn), lambda j, i: (i, j)),
        )
        return pl.pallas_call(
            patch_embed_kernel,
            out_shape=jax.ShapeDtypeStruct((M_pad, E_pad), out_dtype),
            grid_spec=grid_spec,
            compiler_params=compiler_params,
            cost_estimate=cost,
        )(patches, w_flat, b2)

    try:
        out = _run(True)
    except Exception:
        # This jax/Mosaic build rejects pipeline_mode: fall back to default
        # double-buffering (the VMEM budget above already accounts for it).
        out = _run(False)

    return out[:M, :E].reshape(B, Hp * Wp, E)


def _reference(x, weight, bias, patch_size):
    B, C, H, W = x.shape
    E = weight.shape[0]
    p = patch_size
    Hp, Wp = H // p, W // p
    patches = (
        x.reshape(B, C, Hp, p, Wp, p)
        .transpose(0, 2, 4, 1, 3, 5)
        .reshape(B, Hp * Wp, C * p * p)
    )
    return patches @ weight.reshape(E, -1).T + bias[None, None, :]


if __name__ == "__main__":
    key = jax.random.PRNGKey(0)
    k1, k2, k3, k4, k5, k6 = jax.random.split(key, 6)

    # --- case 1: default bf16 compute path (B=2, C=4, 16x16, p=8, E=128) ----
    B, C, H, W = 2, 4, 16, 16
    patch_size = 8
    embed_dim = 128
    x = jax.random.normal(k1, (B, C, H, W), dtype=jnp.float32)
    fan_in = C * patch_size * patch_size
    bound = 1.0 / (fan_in ** 0.5)
    weight = jax.random.uniform(
        k2, (embed_dim, C, patch_size, patch_size),
        minval=-bound, maxval=bound, dtype=jnp.float32)
    bias = jax.random.uniform(
        k3, (embed_dim,), minval=-bound, maxval=bound, dtype=jnp.float32)

    out = jax.block_until_ready(patch_embed_2d(x, weight, bias, patch_size))
    num_patches = (H // patch_size) * (W // patch_size)
    assert out.shape == (B, num_patches, embed_dim), out.shape
    # bf16-matched reference (same rounding of inputs, f32 accumulation).
    ref_bf16 = _reference(
        x.astype(jnp.bfloat16).astype(jnp.float32),
        weight.astype(jnp.bfloat16).astype(jnp.float32),
        bias, patch_size)
    assert jnp.allclose(out, ref_bf16, atol=1e-2, rtol=1e-2), \
        float(jnp.max(jnp.abs(out - ref_bf16)))
    # loose sanity check against the exact f32 reference (catches layout bugs).
    ref_f32 = _reference(x, weight, bias, patch_size)
    assert jnp.allclose(out, ref_f32, atol=8e-2, rtol=8e-2), \
        float(jnp.max(jnp.abs(out - ref_f32)))

    # --- case 2: explicit f32 compute; exercises K-padding (48->128),
    # E-padding (96->128) and the multi-M-tile path (grid m = 2) --------------
    B2, C2, H2, W2, p2, E2 = 2, 3, 16, 16, 4, 96
    x2 = jax.random.normal(k4, (B2, C2, H2, W2), dtype=jnp.float32)
    bound2 = 1.0 / ((C2 * p2 * p2) ** 0.5)
    weight2 = jax.random.uniform(
        k5, (E2, C2, p2, p2), minval=-bound2, maxval=bound2, dtype=jnp.float32)
    bias2 = jax.random.uniform(
        k6, (E2,), minval=-bound2, maxval=bound2, dtype=jnp.float32)

    out2 = jax.block_until_ready(
        patch_embed_2d(x2, weight2, bias2, p2, compute_dtype=jnp.float32))
    ref2 = _reference(x2, weight2, bias2, p2)
    assert out2.shape == (B2, (H2 // p2) * (W2 // p2), E2), out2.shape
    assert jnp.allclose(out2, ref2, atol=1e-5, rtol=1e-5), \
        float(jnp.max(jnp.abs(out2 - ref2)))

    print("KERNEL_OK")
</pallas_src>

<mosaic_0001>
module attributes {stable_mosaic.version = 11 : i64} {
  func.func @patch_embed_kernel(%arg0: i32, %arg1: i32, %arg2: memref<16x256xbf16, #tpu.memory_space<vmem>>, %arg3: memref<256x128xbf16, #tpu.memory_space<vmem>>, %arg4: memref<1x128xf32, #tpu.memory_space<vmem>>, %arg5: memref<16x128xf32, #tpu.memory_space<vmem>>) attributes {dimension_semantics = [#tpu.dimension_semantics<parallel>, #tpu.dimension_semantics<parallel>], iteration_bounds = array<i64: 1, 1>, scalar_prefetch = 0 : i64, scratch_operands = 0 : i64, tpu.core_type = #tpu.core_type<tc>, window_params = [{transform_indices = @transform_0, window_bounds = array<i64: 16, 256>}, {pipeline_mode = #tpu.pipeline_mode<synchronous>, transform_indices = @transform_1, window_bounds = array<i64: 256, 128>}, {pipeline_mode = #tpu.pipeline_mode<synchronous>, transform_indices = @transform_2, window_bounds = array<i64: 1, 128>}, {transform_indices = @transform_3, window_bounds = array<i64: 16, 128>}]} {
    %c0 = arith.constant 0 : index
    %c0_0 = arith.constant 0 : index
    %0 = vector.load %arg2[%c0, %c0_0] : memref<16x256xbf16, #tpu.memory_space<vmem>>, vector<16x256xbf16>
    %c0_1 = arith.constant 0 : index
    %c0_2 = arith.constant 0 : index
    %1 = vector.load %arg3[%c0_1, %c0_2] : memref<256x128xbf16, #tpu.memory_space<vmem>>, vector<256x128xbf16>
    %cst = arith.constant dense<0.000000e+00> : vector<16x128xf32>
    %2 = tpu.matmul %0, %1, %cst {dimension_numbers = #tpu.dot_dimension_numbers<[1], [0], [0], [1], [0, 0, 1, 1], [], []>} : vector<16x256xbf16>, vector<256x128xbf16>, vector<16x128xf32> -> vector<16x128xf32>
    %c0_3 = arith.constant 0 : index
    %c0_4 = arith.constant 0 : index
    %3 = vector.load %arg4[%c0_3, %c0_4] : memref<1x128xf32, #tpu.memory_space<vmem>>, vector<1x128xf32>
    %4 = vector.broadcast %3 : vector<1x128xf32> to vector<16x128xf32>
    %5 = arith.addf %2, %4 : vector<16x128xf32>
    %c0_5 = arith.constant 0 : index
    %c0_6 = arith.constant 0 : index
    %6 = vector.load %arg5[%c0_5, %c0_6] : memref<16x128xf32, #tpu.memory_space<vmem>>, vector<16x128xf32>
    tpu.vector_store %arg5[%c0_5, %c0_6], %5 {strides = array<i32>} : memref<16x128xf32, #tpu.memory_space<vmem>>, vector<16x128xf32>,
    return
  }
  func.func @transform_0(%arg0: i32, %arg1: i32) -> (i32, i32) {
    %c0_i32 = arith.constant 0 : i32
    %c0_i32_0 = arith.constant 0 : i32
    return %arg1, %c0_i32 : i32, i32
  }
  func.func @transform_1(%arg0: i32, %arg1: i32) -> (i32, i32) {
    %c0_i32 = arith.constant 0 : i32
    %c0_i32_0 = arith.constant 0 : i32
    return %c0_i32, %arg0 : i32, i32
  }
  func.func @transform_2(%arg0: i32, %arg1: i32) -> (i32, i32) {
    %c0_i32 = arith.constant 0 : i32
    %c0_i32_0 = arith.constant 0 : i32
    return %c0_i32, %arg0 : i32, i32
  }
  func.func @transform_3(%arg0: i32, %arg1: i32) -> (i32, i32) {
    %c0_i32 = arith.constant 0 : i32
    return %arg1, %arg0 : i32, i32
  }
}

module attributes {stable_mosaic.version = 11 : i64} {
  func.func @patch_embed_kernel(%arg0: i32, %arg1: i32, %arg2: memref<16x256xbf16, #tpu.memory_space<vmem>>, %arg3: memref<256x128xbf16, #tpu.memory_space<vmem>>, %arg4: memref<1x128xf32, #tpu.memory_space<vmem>>, %arg5: memref<16x128xf32, #tpu.memory_space<vmem>>) attributes {dimension_semantics = [#tpu.dimension_semantics<parallel>, #tpu.dimension_semantics<parallel>], iteration_bounds = array<i64: 1, 1>, scalar_prefetch = 0 : i64, scratch_operands = 0 : i64, tpu.core_type = #tpu.core_type<tc>, window_params = [{transform_indices = @transform_0, window_bounds = array<i64: 16, 256>}, {transform_indices = @transform_1, window_bounds = array<i64: 256, 128>}, {transform_indices = @transform_2, window_bounds = array<i64: 1, 128>}, {transform_indices = @transform_3, window_bounds = array<i64: 16, 128>}]} {
    %c0 = arith.constant 0 : index
    %c0_0 = arith.constant 0 : index
    %0 = vector.load %arg2[%c0, %c0_0] : memref<16x256xbf16, #tpu.memory_space<vmem>>, vector<16x256xbf16>
    %c0_1 = arith.constant 0 : index
    %c0_2 = arith.constant 0 : index
    %1 = vector.load %arg3[%c0_1, %c0_2] : memref<256x128xbf16, #tpu.memory_space<vmem>>, vector<256x128xbf16>
    %cst = arith.constant dense<0.000000e+00> : vector<16x128xf32>
    %2 = tpu.matmul %0, %1, %cst {dimension_numbers = #tpu.dot_dimension_numbers<[1], [0], [0], [1], [0, 0, 1, 1], [], []>} : vector<16x256xbf16>, vector<256x128xbf16>, vector<16x128xf32> -> vector<16x128xf32>
    %c0_3 = arith.constant 0 : index
    %c0_4 = arith.constant 0 : index
    %3 = vector.load %arg4[%c0_3, %c0_4] : memref<1x128xf32, #tpu.memory_space<vmem>>, vector<1x128xf32>
    %4 = vector.broadcast %3 : vector<1x128xf32> to vector<16x128xf32>
    %5 = arith.addf %2, %4 : vector<16x128xf32>
    %c0_5 = arith.constant 0 : index
    %c0_6 = arith.constant 0 : index
    %6 = vector.load %arg5[%c0_5, %c0_6] : memref<16x128xf32, #tpu.memory_space<vmem>>, vector<16x128xf32>
    tpu.vector_store %arg5[%c0_5, %c0_6], %5 {strides = array<i32>} : memref<16x128xf32, #tpu.memory_space<vmem>>, vector<16x128xf32>,
    return
  }
  func.func @transform_0(%arg0: i32, %arg1: i32) -> (i32, i32) {
    %c0_i32 = arith.constant 0 : i32
    %c0_i32_0 = arith.constant 0 : i32
    return %arg1, %c0_i32 : i32, i32
  }
  func.func @transform_1(%arg0: i32, %arg1: i32) -> (i32, i32) {
    %c0_i32 = arith.constant 0 : i32
    %c0_i32_0 = arith.constant 0 : i32
    return %c0_i32, %arg0 : i32, i32
  }
  func.func @transform_2(%arg0: i32, %arg1: i32) -> (i32, i32) {
    %c0_i32 = arith.constant 0 : i32
    %c0_i32_0 = arith.constant 0 : i32
    return %c0_i32, %arg0 : i32, i32
  }
  func.func @transform_3(%arg0: i32, %arg1: i32) -> (i32, i32) {
    %c0_i32 = arith.constant 0 : i32
    return %arg1, %arg0 : i32, i32
  }
}

</mosaic_0001>

<bundles_post_ra>
// kernel: tpu_custom_call.1
= control target key start
LH: loop header
LB: loop body
LE: loop exit
PB: predicated region body
PF: predicated region fallthrough
CT: control target
= control target key end

     0   :  { %8 = vsyncpa [#allocation3], 0  ;;  %s463_s0 = inlined_call_operand.hbm [shape: bf16[16,256], index: 0, kind: input, shape index: {}]   ;;  %s464_s1 = inlined_call_operand.hbm [shape: bf16[256,128], index: 1, kind: input, shape index: {}]   ;;  %s465_s2 = inlined_call_operand.vmem [shape: f32[1,128], index: 2, kind: input, shape index: {}]   ;;  %s466_s3 = inlined_call_operand.hbm [shape: f32[16,128], index: 3, kind: output, shape index: {}]  }
   0x1   :  { %9 = vsyncpa [#allocation6], 0 }
   0x2   :  { %10 = vsyncpa [#allocation4], 0  ;;  %s391_s12 = smov [#allocation2]   ;;  %s319_s16 = scalar_lea.hbm %s463_s0, 256 }
   0x3   :  { %s16_s13 = sshll.u32 %s391_s12, 4  ;;  %p320_p0 = scmp.ne.s32.totalorder %s463_s0, %s319_s16  ;;  %s17_s13 = int_to_ptr.vmem [resolvable:$true] %s16_s13 }
   0x4   :  { %p323_p1 = scmp.lt.u32.totalorder %s319_s16, %s463_s0 }
   0x6   :  { %p325_p2 = pnand %p323_p1, %p320_p0 }
   0x8   :  { %328 = shalt.err (!%p325_p2)
}
   0x9   :  { %s329_s21 = scalar_lea.vmem %s17_s13, 256  ;;  %p334_p4 = scmp.lt.s32.totalorder %s17_s13, %s17_s13 }
   0xa   :  { %p330_p3 = scmp.ne.s32.totalorder %s17_s13, %s329_s21  ;;  %p335_p5 = scmp.lt.s32.totalorder %s329_s21, %s329_s21 }
   0xc   :  { %p336_p6 = por %p335_p5, %p334_p4 }
   0xe   :  { %p337_p7 = pnand %p336_p6, %p330_p3 }
  0x10   :  { %340 = shalt.err (!%p337_p7)
}
  0x11   :  { %s392_s22 = smov 128   ;;  %s393_s23 = smov 8  }
  0x12   :  { %22 = dma.hbm_to_vmem [thread:$0]  %s463_s0, 256, %s17_s13, [#allocation3], %s392_s22, %s392_s22, %s393_s23  }
  0x13   :  { %s394_s26 = smov [#allocation5]   ;;  %s341_s30 = scalar_lea.hbm %s464_s1, 2048 }
  0x14   :  { %s28_s27 = sshll.u32 %s394_s26, 4  ;;  %p342_p8 = scmp.ne.s32.totalorder %s464_s1, %s341_s30  ;;  %s29_s27 = int_to_ptr.vmem [resolvable:$true] %s28_s27 }
  0x15   :  { %p345_p9 = scmp.lt.u32.totalorder %s341_s30, %s464_s1 }
  0x17   :  { %p347_p10 = pnand %p345_p9, %p342_p8 }
  0x19   :  { %350 = shalt.err (!%p347_p10)
}
  0x1a   :  { %s351_s8 = scalar_lea.vmem %s29_s27, 2048  ;;  %p356_p12 = scmp.lt.s32.totalorder %s29_s27, %s29_s27 }
  0x1b   :  { %p352_p11 = scmp.ne.s32.totalorder %s29_s27, %s351_s8  ;;  %p357_p13 = scmp.lt.s32.totalorder %s351_s8, %s351_s8 }
  0x1d   :  { %p358_p0 = por %p357_p13, %p356_p12 }
  0x1f   :  { %p359_p1 = pnand %p358_p0, %p352_p11 }
  0x21   :  { %362 = shalt.err (!%p359_p1)
}
  0x22   :  { %s395_s0 = smov 64   ;;  %s396_s9 = smov 4  }
  0x23   :  { %34 = dma.hbm_to_vmem [thread:$0]  %s464_s1, 2048, %s29_s27, [#allocation6], %s395_s0, %s395_s0, %s396_s9  }
  0x24   :  { %385 = dma.done.wait [#allocation3], 256  }
  0x25   :  { %386 = vsyncadd [#allocation3], 4294967040 }
  0x26   :  { %387 = dma.done.wait [#allocation6], 2048  }
  0x27   :  { %388 = vsyncadd [#allocation6], 4294965248  ;;  %v300_v0 = vld [vmem:[#allocation5 + $0x40] sm:$0xff]   ;;  %v302_v2 = vld [vmem:[#allocation5 + $0x48] sm:$0xff]   ;;  %s397_s13 = smov [#allocation7]  }
  0x28   :  { %v301_v1 = vld [vmem:[#allocation5] sm:$0xff]   ;;  %271 = vmatprep.subr.bf16.mxu0 %v300_v0  ;;  %v303_v3 = vld [vmem:[#allocation5 + $0x8] sm:$0xff]   ;;  %v304_v4 = vld [vmem:[#allocation5 + $0x50] sm:$0xff]   ;;  %s239_s14 = sshll.u32 %s397_s13, 4  ;;  %s240_s14 = int_to_ptr.vmem [resolvable:$true] %s239_s14 }
  0x29   :  { %272 = vmatpush3.bf16.msra.mxu0 %v301_v1  ;;  %v305_v5 = vld [vmem:[#allocation5 + $0x10] sm:$0xff]   ;;  %v306_v6 = vld [vmem:[#allocation5 + $0x58] sm:$0xff]   ;;  %v308_v8 = vld [vmem:[#allocation5 + $0x60] sm:$0xff]   ;;  %s363_s15 = scalar_lea.vmem %s240_s14, 256  ;;  %p368_p3 = scmp.lt.s32.totalorder %s240_s14, %s240_s14 }
  0x2a   :  { %273 = vmatprep.subr.bf16.mxu0 %v302_v2  ;;  %v307_v7 = vld [vmem:[#allocation5 + $0x18] sm:$0xff]   ;;  %v309_v9 = vld [vmem:[#allocation5 + $0x20] sm:$0xff]   ;;  %v310_v10 = vld [vmem:[#allocation5 + $0x68] sm:$0xff]   ;;  %p364_p2 = scmp.ne.s32.totalorder %s240_s14, %s363_s15  ;;  %p369_p4 = scmp.lt.s32.totalorder %s363_s15, %s363_s15 }
  0x2b   :  { %v318_v11 = vld [vmem:[#allocation2 + $0x4] ss:$8 sps:$4 sm:$0xff]   ;;  %v311_v12 = vld [vmem:[#allocation5 + $0x28] sm:$0xff]   ;;  %v316_v17 = vld [vmem:[#allocation2] ss:$8 sps:$4 sm:$0xff]  }
  0x2c   :  { %223 = vmatprep.mubr.bf16.mxu0 %v318_v11  ;;  %v312_v13 = vld [vmem:[#allocation5 + $0x70] sm:$0xff]   ;;  %v314_v15 = vld [vmem:[#allocation5 + $0x78] sm:$0xff]   ;;  %p370_p5 = por %p369_p4, %p368_p3 }
  0x2d   :  { %274 = vmatpush3.bf16.msra.mxu0 %v303_v3  ;;  %v313_v14 = vld [vmem:[#allocation5 + $0x30] sm:$0xff]   ;;  %v315_v16 = vld [vmem:[#allocation5 + $0x38] sm:$0xff]  }
  0x2e   :  { %275 = vmatprep.subr.bf16.mxu0 %v304_v4  ;;  %v252_v19 = vld [vmem:[%s465_s2] ss:$0 sm:$0xff]  ;;  %p371_p6 = pnand %p370_p5, %p364_p2 }
  0x31   :  { %276 = vmatpush3.bf16.msra.mxu0 %v305_v5 }
  0x32   :  { %277 = vmatprep.subr.bf16.mxu0 %v306_v6 }
  0x35   :  { %278 = vmatpush3.bf16.msra.mxu0 %v307_v7 }
  0x36   :  { %279 = vmatprep.subr.bf16.mxu0 %v308_v8 }
  0x39   :  { %280 = vmatpush3.bf16.msra.mxu0 %v309_v9 }
  0x3a   :  { %281 = vmatprep.subr.bf16.mxu0 %v310_v10 }
  0x3d   :  { %282 = vmatpush3.bf16.msra.mxu0 %v311_v12 }
  0x3e   :  { %283 = vmatprep.subr.bf16.mxu0 %v312_v13 }
  0x41   :  { %284 = vmatpush3.bf16.msra.mxu0 %v313_v14 }
  0x42   :  { %285 = vmatprep.subr.bf16.mxu0 %v314_v15 }
  0x45   :  { %286 = vmatpush3.bf16.msra.mxu0 %v315_v16 }
  0x48   :  { %224 = vmatmul.mubr.bf16.vlgmr.msra.gmra.mrb[0].mxu0 %v316_v17 }
 0x11b   :  { %v287_v18 = vpop.f32.mrb[0].mxu0 }
 0x11c   :  { %v288_v20 = vpop.f32.mrb[1].mxu0 }
 0x11d   :  { %v289_v21 = vadd.f32 %v288_v20, %v287_v18  ;;  %v290_v22 = vpop.f32.mrb[2].mxu0 }
 0x11e   :  { %v291_v23 = vpop.f32.mrb[3].mxu0 }
 0x11f   :  { %v226_v24 = vadd.f32 %v289_v21, %v252_v19  ;;  %v292_v25 = vadd.f32 %v291_v23, %v290_v22 }
 0x121   :  { %232 = vst [vmem:[#allocation7] sm:$0xff] %v226_v24  ;;  %v229_v26 = vadd.f32 %v292_v25, %v252_v19 }
 0x123   :  { %233 = vst [vmem:[#allocation7 + $0x8] sm:$0xff] %v229_v26 }
 0x124   :  { %374 = shalt.err (!%p371_p6)
}
 0x125   :  { %s375_s17 = scalar_lea.hbm %s466_s3, 256 }
 0x126   :  { %p376_p7 = scmp.ne.s32.totalorder %s466_s3, %s375_s17  ;;  %p379_p8 = scmp.lt.u32.totalorder %s375_s17, %s466_s3 }
 0x128   :  { %p381_p9 = pnand %p379_p8, %p376_p7 }
 0x12a   :  { %384 = shalt.err (!%p381_p9)
}
 0x12b   :  { %245 = dma.vmem_to_hbm [thread:$0]  %s240_s14, 256, %s466_s3, [#allocation4], %s392_s22, %s392_s22, %s393_s23  }
 0x12c   :  { %389 = dma.done.wait [#allocation4], 256  }
 0x12d   :  { %390 = vsyncadd [#allocation4], 4294967040 }
 0x12e   :  { %249 = vsyncpa [#allocation3], 1 }
 0x12f   :  { %250 = vsyncpa [#allocation6], 1 }
 0x130   :  { %251 = vsyncpa [#allocation4], 1 }

// kernel: tpu_custom_call.1
= control target key start
LH: loop header
LB: loop body
LE: loop exit
PB: predicated region body
PF: predicated region fallthrough
CT: control target
= control target key end

     0   :  { %8 = vsyncpa [#allocation3], 0  ;;  %s463_s0 = inlined_call_operand.hbm [shape: bf16[16,256], index: 0, kind: input, shape index: {}]   ;;  %s464_s1 = inlined_call_operand.hbm [shape: bf16[256,128], index: 1, kind: input, shape index: {}]   ;;  %s465_s2 = inlined_call_operand.vmem [shape: f32[1,128], index: 2, kind: input, shape index: {}]   ;;  %s466_s3 = inlined_call_operand.hbm [shape: f32[16,128], index: 3, kind: output, shape index: {}]  }
   0x1   :  { %9 = vsyncpa [#allocation6], 0 }
   0x2   :  { %10 = vsyncpa [#allocation4], 0  ;;  %s391_s12 = smov [#allocation2]   ;;  %s319_s16 = scalar_lea.hbm %s463_s0, 256 }
   0x3   :  { %s16_s13 = sshll.u32 %s391_s12, 4  ;;  %p320_p0 = scmp.ne.s32.totalorder %s463_s0, %s319_s16  ;;  %s17_s13 = int_to_ptr.vmem [resolvable:$true] %s16_s13 }
   0x4   :  { %p323_p1 = scmp.lt.u32.totalorder %s319_s16, %s463_s0 }
   0x6   :  { %p325_p2 = pnand %p323_p1, %p320_p0 }
   0x8   :  { %328 = shalt.err (!%p325_p2)
}
   0x9   :  { %s329_s21 = scalar_lea.vmem %s17_s13, 256  ;;  %p334_p4 = scmp.lt.s32.totalorder %s17_s13, %s17_s13 }
   0xa   :  { %p330_p3 = scmp.ne.s32.totalorder %s17_s13, %s329_s21  ;;  %p335_p5 = scmp.lt.s32.totalorder %s329_s21, %s329_s21 }
   0xc   :  { %p336_p6 = por %p335_p5, %p334_p4 }
   0xe   :  { %p337_p7 = pnand %p336_p6, %p330_p3 }
  0x10   :  { %340 = shalt.err (!%p337_p7)
}
  0x11   :  { %s392_s22 = smov 128   ;;  %s393_s23 = smov 8  }
  0x12   :  { %22 = dma.hbm_to_vmem [thread:$0]  %s463_s0, 256, %s17_s13, [#allocation3], %s392_s22, %s392_s22, %s393_s23  }
  0x13   :  { %s394_s26 = smov [#allocation5]   ;;  %s341_s30 = scalar_lea.hbm %s464_s1, 2048 }
  0x14   :  { %s28_s27 = sshll.u32 %s394_s26, 4  ;;  %p342_p8 = scmp.ne.s32.totalorder %s464_s1, %s341_s30  ;;  %s29_s27 = int_to_ptr.vmem [resolvable:$true] %s28_s27 }
  0x15   :  { %p345_p9 = scmp.lt.u32.totalorder %s341_s30, %s464_s1 }
  0x17   :  { %p347_p10 = pnand %p345_p9, %p342_p8 }
  0x19   :  { %350 = shalt.err (!%p347_p10)
}
  0x1a   :  { %s351_s8 = scalar_lea.vmem %s29_s27, 2048  ;;  %p356_p12 = scmp.lt.s32.totalorder %s29_s27, %s29_s27 }
  0x1b   :  { %p352_p11 = scmp.ne.s32.totalorder %s29_s27, %s351_s8  ;;  %p357_p13 = scmp.lt.s32.totalorder %s351_s8, %s351_s8 }
  0x1d   :  { %p358_p0 = por %p357_p13, %p356_p12 }
  0x1f   :  { %p359_p1 = pnand %p358_p0, %p352_p11 }
  0x21   :  { %362 = shalt.err (!%p359_p1)
}
  0x22   :  { %s395_s0 = smov 64   ;;  %s396_s9 = smov 4  }
  0x23   :  { %34 = dma.hbm_to_vmem [thread:$0]  %s464_s1, 2048, %s29_s27, [#allocation6], %s395_s0, %s395_s0, %s396_s9  }
  0x24   :  { %385 = dma.done.wait [#allocation3], 256  }
  0x25   :  { %386 = vsyncadd [#allocation3], 4294967040 }
  0x26   :  { %387 = dma.done.wait [#allocation6], 2048  }
  0x27   :  { %388 = vsyncadd [#allocation6], 4294965248  ;;  %v300_v0 = vld [vmem:[#allocation5 + $0x40] sm:$0xff]   ;;  %v302_v2 = vld [vmem:[#allocation5 + $0x48] sm:$0xff]   ;;  %s397_s13 = smov [#allocation7]  }
  0x28   :  { %v301_v1 = vld [vmem:[#allocation5] sm:$0xff]   ;;  %271 = vmatprep.subr.bf16.mxu0 %v300_v0  ;;  %v303_v3 = vld [vmem:[#allocation5 + $0x8] sm:$0xff]   ;;  %v304_v4 = vld [vmem:[#allocation5 + $0x50] sm:$0xff]   ;;  %s239_s14 = sshll.u32 %s397_s13, 4  ;;  %s240_s14 = int_to_ptr.vmem [resolvable:$true] %s239_s14 }
  0x29   :  { %272 = vmatpush3.bf16.msra.mxu0 %v301_v1  ;;  %v305_v5 = vld [vmem:[#allocation5 + $0x10] sm:$0xff]   ;;  %v306_v6 = vld [vmem:[#allocation5 + $0x58] sm:$0xff]   ;;  %v308_v8 = vld [vmem:[#allocation5 + $0x60] sm:$0xff]   ;;  %s363_s15 = scalar_lea.vmem %s240_s14, 256  ;;  %p368_p3 = scmp.lt.s32.totalorder %s240_s14, %s240_s14 }
  0x2a   :  { %273 = vmatprep.subr.bf16.mxu0 %v302_v2  ;;  %v307_v7 = vld [vmem:[#allocation5 + $0x18] sm:$0xff]   ;;  %v309_v9 = vld [vmem:[#allocation5 + $0x20] sm:$0xff]   ;;  %v310_v10 = vld [vmem:[#allocation5 + $0x68] sm:$0xff]   ;;  %p364_p2 = scmp.ne.s32.totalorder %s240_s14, %s363_s15  ;;  %p369_p4 = scmp.lt.s32.totalorder %s363_s15, %s363_s15 }
  0x2b   :  { %v318_v11 = vld [vmem:[#allocation2 + $0x4] ss:$8 sps:$4 sm:$0xff]   ;;  %v311_v12 = vld [vmem:[#allocation5 + $0x28] sm:$0xff]   ;;  %v316_v17 = vld [vmem:[#allocation2] ss:$8 sps:$4 sm:$0xff]  }
  0x2c   :  { %223 = vmatprep.mubr.bf16.mxu0 %v318_v11  ;;  %v312_v13 = vld [vmem:[#allocation5 + $0x70] sm:$0xff]   ;;  %v314_v15 = vld [vmem:[#allocation5 + $0x78] sm:$0xff]   ;;  %p370_p5 = por %p369_p4, %p368_p3 }
  0x2d   :  { %274 = vmatpush3.bf16.msra.mxu0 %v303_v3  ;;  %v313_v14 = vld [vmem:[#allocation5 + $0x30] sm:$0xff]   ;;  %v315_v16 = vld [vmem:[#allocation5 + $0x38] sm:$0xff]  }
  0x2e   :  { %275 = vmatprep.subr.bf16.mxu0 %v304_v4  ;;  %v252_v19 = vld [vmem:[%s465_s2] ss:$0 sm:$0xff]  ;;  %p371_p6 = pnand %p370_p5, %p364_p2 }
  0x31   :  { %276 = vmatpush3.bf16.msra.mxu0 %v305_v5 }
  0x32   :  { %277 = vmatprep.subr.bf16.mxu0 %v306_v6 }
  0x35   :  { %278 = vmatpush3.bf16.msra.mxu0 %v307_v7 }
  0x36   :  { %279 = vmatprep.subr.bf16.mxu0 %v308_v8 }
  0x39   :  { %280 = vmatpush3.bf16.msra.mxu0 %v309_v9 }
  0x3a   :  { %281 = vmatprep.subr.bf16.mxu0 %v310_v10 }
  0x3d   :  { %282 = vmatpush3.bf16.msra.mxu0 %v311_v12 }
  0x3e   :  { %283 = vmatprep.subr.bf16.mxu0 %v312_v13 }
  0x41   :  { %284 = vmatpush3.bf16.msra.mxu0 %v313_v14 }
  0x42   :  { %285 = vmatprep.subr.bf16.mxu0 %v314_v15 }
  0x45   :  { %286 = vmatpush3.bf16.msra.mxu0 %v315_v16 }
  0x48   :  { %224 = vmatmul.mubr.bf16.vlgmr.msra.gmra.mrb[0].mxu0 %v316_v17 }
 0x11b   :  { %v287_v18 = vpop.f32.mrb[0].mxu0 }
 0x11c   :  { %v288_v20 = vpop.f32.mrb[1].mxu0 }
 0x11d   :  { %v289_v21 = vadd.f32 %v288_v20, %v287_v18  ;;  %v290_v22 = vpop.f32.mrb[2].mxu0 }
 0x11e   :  { %v291_v23 = vpop.f32.mrb[3].mxu0 }
 0x11f   :  { %v226_v24 = vadd.f32 %v289_v21, %v252_v19  ;;  %v292_v25 = vadd.f32 %v291_v23, %v290_v22 }
 0x121   :  { %232 = vst [vmem:[#allocation7] sm:$0xff] %v226_v24  ;;  %v229_v26 = vadd.f32 %v292_v25, %v252_v19 }
 0x123   :  { %233 = vst [vmem:[#allocation7 + $0x8] sm:$0xff] %v229_v26 }
 0x124   :  { %374 = shalt.err (!%p371_p6)
}
 0x125   :  { %s375_s17 = scalar_lea.hbm %s466_s3, 256 }
 0x126   :  { %p376_p7 = scmp.ne.s32.totalorder %s466_s3, %s375_s17  ;;  %p379_p8 = scmp.lt.u32.totalorder %s375_s17, %s466_s3 }
 0x128   :  { %p381_p9 = pnand %p379_p8, %p376_p7 }
 0x12a   :  { %384 = shalt.err (!%p381_p9)
}
 0x12b   :  { %245 = dma.vmem_to_hbm [thread:$0]  %s240_s14, 256, %s466_s3, [#allocation4], %s392_s22, %s392_s22, %s393_s23  }
 0x12c   :  { %389 = dma.done.wait [#allocation4], 256  }
 0x12d   :  { %390 = vsyncadd [#allocation4], 4294967040 }
 0x12e   :  { %249 = vsyncpa [#allocation3], 1 }
 0x12f   :  { %250 = vsyncpa [#allocation6], 1 }
 0x130   :  { %251 = vsyncpa [#allocation4], 1 }

</bundles_post_ra>
